<compile_context>
chip_gen: v6e
topology: v6e:2x2x1
jax: 0.10.0
libtpu: 0.0.40
codegen_flags: <defaults>
</compile_context>

<pallas_src>
import math

import jax
import jax.numpy as jnp
from jax import lax
from jax.experimental import pallas as pl
from jax.experimental.pallas import tpu as pltpu

# Segment boundaries and LUT (compile-time constants, matching the torch module).
SEGMENT = (0.0001, 0.002, 0.004, 0.007, 0.01, 0.03, 0.1, 0.2,
           0.3, 1.0, 2.0, 4.0, 8.0, 16.0, 64.0, 1024.0)
LUT = tuple(1.0 / math.sqrt(s) for s in SEGMENT)
NSEG = len(SEGMENT)            # 16 boundaries
NPIECE = NSEG - 1              # 15 linear pieces

# Per-piece slope / intercept, precomputed in double precision at trace time.
# On piece k:  y = SLOPE[k] * x + INTERCEPT[k].
SLOPE = tuple((LUT[k + 1] - LUT[k]) / (SEGMENT[k + 1] - SEGMENT[k])
              for k in range(NPIECE))
INTERCEPT = tuple(LUT[k] - SLOPE[k] * SEGMENT[k] for k in range(NPIECE))

_LANE = 128
_MAX_ROW_BLOCK = 2048   # 2048x128 f32 = 1 MiB/block; in+out double-buffered = 4 MiB VMEM
_MIN_GRID_STEPS = 8     # enough steps to pipeline DMAs and feed both v7x TCs
_SUB_ROWS = 32          # 32x128 f32 = 4 vregs per temp in the select chain


def _invsqrt_kernel(x_ref, o_ref):
    block_rows = x_ref.shape[0]
    sub = min(_SUB_ROWS, block_rows)
    num_sub = block_rows // sub   # exact by construction (powers of two / full block)

    # Hoisted coefficient splats (piece 0 is the default).
    m0 = jnp.full((sub, _LANE), SLOPE[0], dtype=jnp.float32)
    c0 = jnp.full((sub, _LANE), INTERCEPT[0], dtype=jnp.float32)

    def body(i, carry):
        r = pl.multiple_of(i * sub, sub)
        # Cast in-register: input block stays in its native dtype in HBM/VMEM.
        x = x_ref[pl.ds(r, sub), :].astype(jnp.float32)
        xc = jnp.clip(x, jnp.float32(SEGMENT[0]), jnp.float32(SEGMENT[-1]))

        # Threshold select-chain over precomputed slope/intercept constants.
        # Compares use the unclipped x (same truth values as xc) so they don't
        # serialize behind the clip.  At an exact boundary this picks the
        # right-hand piece, which agrees with the bucketize(right=False)-1
        # reference up to f32 rounding (adjacent pieces share the boundary).
        m = m0
        c = c0
        for k in range(1, NPIECE):
            sel = x >= jnp.float32(SEGMENT[k])
            m = jnp.where(sel, jnp.float32(SLOPE[k]), m)
            c = jnp.where(sel, jnp.float32(INTERCEPT[k]), c)

        o_ref[pl.ds(r, sub), :] = (m * xc + c).astype(o_ref.dtype)
        return carry

    if num_sub == 1:
        body(0, 0)
    else:
        lax.fori_loop(0, num_sub, body, 0)


@jax.jit
def inv_sqrt_approx_16segment(x):
    """Elementwise piecewise-linear 1/sqrt approximation. x: any-shape float."""
    orig_shape = x.shape
    flat = x.reshape(-1)
    n = flat.shape[0]

    # Only the lane-dim tail (< 128 elements) needs padding; row raggedness is
    # handled by the cdiv grid with a partial last block.
    n_pad = (-n) % _LANE
    if n_pad:
        flat = jnp.pad(flat, (0, n_pad), constant_values=1.0)
    rows = flat.shape[0] // _LANE
    x2d = flat.reshape(rows, _LANE)

    # Fixed large block, shrunk (powers of two, multiple of 8) only until the
    # grid has at least _MIN_GRID_STEPS steps so pipelining / megacore sharding
    # actually engage.  Tiny inputs (rows <= 8) take the full array as a block.
    if rows <= 8:
        row_block = rows
    else:
        row_block = _MAX_ROW_BLOCK
        while row_block > 8 and pl.cdiv(rows, row_block) < _MIN_GRID_STEPS:
            row_block //= 2

    grid = (pl.cdiv(rows, row_block),)

    out2d = pl.pallas_call(
        _invsqrt_kernel,
        out_shape=jax.ShapeDtypeStruct((rows, _LANE), jnp.float32),
        grid_spec=pltpu.PrefetchScalarGridSpec(
            num_scalar_prefetch=0,
            grid=grid,
            in_specs=[pl.BlockSpec((row_block, _LANE), lambda i: (i, 0))],
            out_specs=pl.BlockSpec((row_block, _LANE), lambda i: (i, 0)),
        ),
        compiler_params=pltpu.CompilerParams(
            dimension_semantics=("parallel",)),
    )(x2d)

    if n_pad:
        return out2d.reshape(-1)[:n].reshape(orig_shape)
    return out2d.reshape(orig_shape)


def _reference(x):
    """Pure-JAX reference mirroring the torch module exactly."""
    seg = jnp.asarray(SEGMENT, jnp.float32)
    lut = jnp.asarray(LUT, jnp.float32)
    xc = jnp.clip(x.astype(jnp.float32), SEGMENT[0], SEGMENT[-1])
    idx = jnp.searchsorted(seg, xc, side="left") - 1
    idx = jnp.clip(idx, 0, NPIECE - 1)
    x0 = seg[idx]
    x1 = seg[idx + 1]
    y0 = lut[idx]
    y1 = lut[idx + 1]
    t = (xc - x0) / (x1 - x0)
    return y0 + t * (y1 - y0)


if __name__ == "__main__":
    key = jax.random.PRNGKey(0)
    # NCHW input, same convention as the torch module's callers.
    x = jax.random.uniform(key, (2, 4, 16, 16), jnp.float32,
                           minval=0.0, maxval=2000.0)

    out = inv_sqrt_approx_16segment(x)
    out = jax.block_until_ready(out)

    ref = _reference(x)
    assert out.shape == x.shape and out.dtype == jnp.float32
    assert jnp.allclose(out, ref, rtol=1e-5, atol=1e-5), "mismatch vs reference"

    print("KERNEL_OK")
</pallas_src>

<mosaic_0001>
module attributes {stable_mosaic.version = 11 : i64} {
  func.func @_invsqrt_kernel(%arg0: i32, %arg1: memref<8x128xf32, #tpu.memory_space<vmem>>, %arg2: memref<8x128xf32, #tpu.memory_space<vmem>>) attributes {dimension_semantics = [#tpu.dimension_semantics<parallel>], iteration_bounds = array<i64: 2>, scalar_prefetch = 0 : i64, scratch_operands = 0 : i64, tpu.core_type = #tpu.core_type<tc>, window_params = [{transform_indices = @transform_0, window_bounds = array<i64: 8, 128>}, {transform_indices = @transform_1, window_bounds = array<i64: 8, 128>}]} {
    %cst = arith.constant -4.086280e+04 : f32
    %0 = vector.broadcast %cst : f32 to vector<8x128xf32>
    %cst_0 = arith.constant 104.086281 : f32
    %1 = vector.broadcast %cst_0 : f32 to vector<8x128xf32>
    %c0_i32 = arith.constant 0 : i32
    %2 = tpu.assume_multiple %c0_i32, 8 : i32
    %3 = arith.index_cast %2 : i32 to index
    %c0 = arith.constant 0 : index
    %4 = vector.load %arg1[%3, %c0] : memref<8x128xf32, #tpu.memory_space<vmem>>, vector<8x128xf32>
    %cst_1 = arith.constant 9.99999974E-5 : f32
    %cst_2 = arith.constant 1.024000e+03 : f32
    %5 = vector.broadcast %cst_1 : f32 to vector<8x128xf32>
    %6 = arith.maximumf %5, %4 : vector<8x128xf32>
    %7 = vector.broadcast %cst_2 : f32 to vector<8x128xf32>
    %8 = arith.minimumf %7, %6 : vector<8x128xf32>
    %cst_3 = arith.constant 2.000000e-03 : f32
    %9 = vector.broadcast %cst_3 : f32 to vector<8x128xf32>
    %10 = arith.cmpf oge, %4, %9 : vector<8x128xf32>
    %cst_4 = arith.constant -3274.64575 : f32
    %11 = vector.broadcast %cst_4 : f32 to vector<8x128xf32>
    %12 = arith.select %10, %11, %0 : vector<8x128xi1>, vector<8x128xf32>
    %cst_5 = arith.constant 28.9099712 : f32
    %13 = vector.broadcast %cst_5 : f32 to vector<8x128xf32>
    %14 = arith.select %10, %13, %1 : vector<8x128xi1>, vector<8x128xf32>
    %cst_6 = arith.constant 4.000000e-03 : f32
    %15 = vector.broadcast %cst_6 : f32 to vector<8x128xf32>
    %16 = arith.cmpf oge, %4, %15 : vector<8x128xf32>
    %cst_7 = arith.constant -1286.36743 : f32
    %17 = vector.broadcast %cst_7 : f32 to vector<8x128xf32>
    %18 = arith.select %16, %17, %12 : vector<8x128xi1>, vector<8x128xf32>
    %cst_8 = arith.constant 20.9568577 : f32
    %19 = vector.broadcast %cst_8 : f32 to vector<8x128xf32>
    %20 = arith.select %16, %19, %14 : vector<8x128xi1>, vector<8x128xf32>
    %cst_9 = arith.constant 7.000000e-03 : f32
    %21 = vector.broadcast %cst_9 : f32 to vector<8x128xf32>
    %22 = arith.cmpf oge, %4, %21 : vector<8x128xf32>
    %cst_10 = arith.constant -6.507620e+02 : f32
    %23 = vector.broadcast %cst_10 : f32 to vector<8x128xf32>
    %24 = arith.select %22, %23, %18 : vector<8x128xi1>, vector<8x128xf32>
    %cst_11 = arith.constant 16.5076199 : f32
    %25 = vector.broadcast %cst_11 : f32 to vector<8x128xf32>
    %26 = arith.select %22, %25, %20 : vector<8x128xi1>, vector<8x128xf32>
    %cst_12 = arith.constant 0.00999999977 : f32
    %27 = vector.broadcast %cst_12 : f32 to vector<8x128xf32>
    %28 = arith.cmpf oge, %4, %27 : vector<8x128xf32>
    %cst_13 = arith.constant -211.32486 : f32
    %29 = vector.broadcast %cst_13 : f32 to vector<8x128xf32>
    %30 = arith.select %28, %29, %24 : vector<8x128xi1>, vector<8x128xf32>
    %cst_14 = arith.constant 12.1132488 : f32
    %31 = vector.broadcast %cst_14 : f32 to vector<8x128xf32>
    %32 = arith.select %28, %31, %26 : vector<8x128xi1>, vector<8x128xf32>
    %cst_15 = arith.constant 3.000000e-02 : f32
    %33 = vector.broadcast %cst_15 : f32 to vector<8x128xf32>
    %34 = arith.cmpf oge, %4, %33 : vector<8x128xf32>
    %cst_16 = arith.constant -37.303215 : f32
    %35 = vector.broadcast %cst_16 : f32 to vector<8x128xf32>
    %36 = arith.select %34, %35, %30 : vector<8x128xi1>, vector<8x128xf32>
    %cst_17 = arith.constant 6.89259911 : f32
    %37 = vector.broadcast %cst_17 : f32 to vector<8x128xf32>
    %38 = arith.select %34, %37, %32 : vector<8x128xi1>, vector<8x128xf32>
    %cst_18 = arith.constant 1.000000e-01 : f32
    %39 = vector.broadcast %cst_18 : f32 to vector<8x128xf32>
    %40 = arith.cmpf oge, %4, %39 : vector<8x128xf32>
    %cst_19 = arith.constant -9.2620964 : f32
    %41 = vector.broadcast %cst_19 : f32 to vector<8x128xf32>
    %42 = arith.select %40, %41, %36 : vector<8x128xi1>, vector<8x128xf32>
    %cst_20 = arith.constant 4.08848715 : f32
    %43 = vector.broadcast %cst_20 : f32 to vector<8x128xf32>
    %44 = arith.select %40, %43, %38 : vector<8x128xi1>, vector<8x128xf32>
    %cst_21 = arith.constant 2.000000e-01 : f32
    %45 = vector.broadcast %cst_21 : f32 to vector<8x128xf32>
    %46 = arith.cmpf oge, %4, %45 : vector<8x128xf32>
    %cst_22 = arith.constant -4.10326099 : f32
    %47 = vector.broadcast %cst_22 : f32 to vector<8x128xf32>
    %48 = arith.select %46, %47, %42 : vector<8x128xi1>, vector<8x128xf32>
    %cst_23 = arith.constant 3.05672026 : f32
    %49 = vector.broadcast %cst_23 : f32 to vector<8x128xf32>
    %50 = arith.select %46, %49, %44 : vector<8x128xi1>, vector<8x128xf32>
    %cst_24 = arith.constant 3.000000e-01 : f32
    %51 = vector.broadcast %cst_24 : f32 to vector<8x128xf32>
    %52 = arith.cmpf oge, %4, %51 : vector<8x128xf32>
    %cst_25 = arith.constant -1.17963123 : f32
    %53 = vector.broadcast %cst_25 : f32 to vector<8x128xf32>
    %54 = arith.select %52, %53, %48 : vector<8x128xi1>, vector<8x128xf32>
    %cst_26 = arith.constant 2.17963123 : f32
    %55 = vector.broadcast %cst_26 : f32 to vector<8x128xf32>
    %56 = arith.select %52, %55, %50 : vector<8x128xi1>, vector<8x128xf32>
    %cst_27 = arith.constant 1.000000e+00 : f32
    %57 = vector.broadcast %cst_27 : f32 to vector<8x128xf32>
    %58 = arith.cmpf oge, %4, %57 : vector<8x128xf32>
    %cst_28 = arith.constant -0.292893231 : f32
    %59 = vector.broadcast %cst_28 : f32 to vector<8x128xf32>
    %60 = arith.select %58, %59, %54 : vector<8x128xi1>, vector<8x128xf32>
    %cst_29 = arith.constant 1.29289317 : f32
    %61 = vector.broadcast %cst_29 : f32 to vector<8x128xf32>
    %62 = arith.select %58, %61, %56 : vector<8x128xi1>, vector<8x128xf32>
    %cst_30 = arith.constant 2.000000e+00 : f32
    %63 = vector.broadcast %cst_30 : f32 to vector<8x128xf32>
    %64 = arith.cmpf oge, %4, %63 : vector<8x128xf32>
    %cst_31 = arith.constant -0.103553392 : f32
    %65 = vector.broadcast %cst_31 : f32 to vector<8x128xf32>
    %66 = arith.select %64, %65, %60 : vector<8x128xi1>, vector<8x128xf32>
    %cst_32 = arith.constant 0.914213538 : f32
    %67 = vector.broadcast %cst_32 : f32 to vector<8x128xf32>
    %68 = arith.select %64, %67, %62 : vector<8x128xi1>, vector<8x128xf32>
    %cst_33 = arith.constant 4.000000e+00 : f32
    %69 = vector.broadcast %cst_33 : f32 to vector<8x128xf32>
    %70 = arith.cmpf oge, %4, %69 : vector<8x128xf32>
    %cst_34 = arith.constant -0.0366116539 : f32
    %71 = vector.broadcast %cst_34 : f32 to vector<8x128xf32>
    %72 = arith.select %70, %71, %66 : vector<8x128xi1>, vector<8x128xf32>
    %cst_35 = arith.constant 0.646446586 : f32
    %73 = vector.broadcast %cst_35 : f32 to vector<8x128xf32>
    %74 = arith.select %70, %73, %68 : vector<8x128xi1>, vector<8x128xf32>
    %cst_36 = arith.constant 8.000000e+00 : f32
    %75 = vector.broadcast %cst_36 : f32 to vector<8x128xf32>
    %76 = arith.cmpf oge, %4, %75 : vector<8x128xf32>
    %cst_37 = arith.constant -0.012944174 : f32
    %77 = vector.broadcast %cst_37 : f32 to vector<8x128xf32>
    %78 = arith.select %76, %77, %72 : vector<8x128xi1>, vector<8x128xf32>
    %cst_38 = arith.constant 0.457106769 : f32
    %79 = vector.broadcast %cst_38 : f32 to vector<8x128xf32>
    %80 = arith.select %76, %79, %74 : vector<8x128xi1>, vector<8x128xf32>
    %cst_39 = arith.constant 1.600000e+01 : f32
    %81 = vector.broadcast %cst_39 : f32 to vector<8x128xf32>
    %82 = arith.cmpf oge, %4, %81 : vector<8x128xf32>
    %cst_40 = arith.constant -0.00260416674 : f32
    %83 = vector.broadcast %cst_40 : f32 to vector<8x128xf32>
    %84 = arith.select %82, %83, %78 : vector<8x128xi1>, vector<8x128xf32>
    %cst_41 = arith.constant 0.291666657 : f32
    %85 = vector.broadcast %cst_41 : f32 to vector<8x128xf32>
    %86 = arith.select %82, %85, %80 : vector<8x128xi1>, vector<8x128xf32>
    %cst_42 = arith.constant 6.400000e+01 : f32
    %87 = vector.broadcast %cst_42 : f32 to vector<8x128xf32>
    %88 = arith.cmpf oge, %4, %87 : vector<8x128xf32>
    %cst_43 = arith.constant -9.76562514E-5 : f32
    %89 = vector.broadcast %cst_43 : f32 to vector<8x128xf32>
    %90 = arith.select %88, %89, %84 : vector<8x128xi1>, vector<8x128xf32>
    %cst_44 = arith.constant 1.312500e-01 : f32
    %91 = vector.broadcast %cst_44 : f32 to vector<8x128xf32>
    %92 = arith.select %88, %91, %86 : vector<8x128xi1>, vector<8x128xf32>
    %93 = arith.mulf %90, %8 : vector<8x128xf32>
    %94 = arith.addf %93, %92 : vector<8x128xf32>
    %95 = arith.index_cast %2 : i32 to index
    %c0_45 = arith.constant 0 : index
    %96 = vector.load %arg2[%95, %c0_45] : memref<8x128xf32, #tpu.memory_space<vmem>>, vector<8x128xf32>
    tpu.vector_store %arg2[%95, %c0_45], %94 {strides = array<i32>} : memref<8x128xf32, #tpu.memory_space<vmem>>, vector<8x128xf32>,
    return
  }
  func.func @transform_0(%arg0: i32) -> (i32, i32) {
    %c0_i32 = arith.constant 0 : i32
    %c0_i32_0 = arith.constant 0 : i32
    return %arg0, %c0_i32 : i32, i32
  }
  func.func @transform_1(%arg0: i32) -> (i32, i32) {
    %c0_i32 = arith.constant 0 : i32
    %c0_i32_0 = arith.constant 0 : i32
    return %arg0, %c0_i32 : i32, i32
  }
}

</mosaic_0001>

<bundles_post_ra>
// kernel: inv_sqrt_approx_16segment.1
= control target key start
LH: loop header
LB: loop body
LE: loop exit
PB: predicated region body
PF: predicated region fallthrough
CT: control target
= control target key end

     0   :  { %s252_s6 = smov 0   ;;  %s278_s0 = inlined_call_operand.vmem [shape: f32[16,128], index: 0, kind: input, shape index: {}]   ;;  %s279_s1 = inlined_call_operand.vmem [shape: f32[16,128], index: 1, kind: output, shape index: {}]  }
   0x1 LB: > { %s213_s7 = sadd.s32 4294967295, %s238_s6   ;;  %p217_p0 = scmp.ge.s32.totalorder %s238_s6, 1  ;;  %s238_s6 = sphi %s252_s6, %s11_s6  }
   0x2   : > { %p86_p1 = scmp.lt.s32.totalorder %s238_s6, 3 }
   0x4   : > { %p87_p2 = pnand %p217_p0, %p86_p1 }
   0x5   : > { %p104_p3 = scmp.lt.s32.totalorder (!%p87_p2), %s213_s7, 1 }
   0x6   : > { %90 = sbr.rel (%p87_p2) target bundleno = 35 (0x23), region = 24 }
   0xb   : > { %s281_s7 = smov (!%p104_p3, %s213_s7), 1  ;;  %v240_v2 = vmov -40862.8   ;;  %v241_v4 = vmov 104.08628  }
   0xc   : > { %s218_s8 = sshll.u32 %s281_s7, 3 }
   0xd   : > { %s107_s11 = scalar_lea.vmem %s278_s0, %s218_s8  ;;  %s111_s14 = scalar_lea.vmem %s279_s1, %s218_s8 }
   0xe   : > { %v112_v0 = vld [vmem:[%s107_s11] sm:$0xff] }
   0xf   : > { %v113_v1 = vmax.f32 %v112_v0, 0.0001  ;;  %vm115_vm0 = vcmp.ge.f32.partialorder %v112_v0, 0.002  ;;  %vm118_vm1 = vcmp.ge.f32.partialorder %v112_v0, 0.004 }
  0x10   : > { %v116_v3 = vsel %vm115_vm0, -3274.6458, %v240_v2  ;;  %v117_v5 = vsel %vm115_vm0, 28.909971, %v241_v4  ;;  %vm121_vm2 = vcmp.ge.f32.partialorder %v112_v0, 0.007 }
  0x11   : > { %v119_v6 = vsel %vm118_vm1, -1286.3674, %v116_v3  ;;  %v120_v7 = vsel %vm118_vm1, 20.956858, %v117_v5  ;;  %vm139_vm3 = vcmp.ge.f32.partialorder %v112_v0, 1.0  ;;  %vm142_vm9 = vcmp.ge.f32.partialorder %v112_v0, 2.0 }
  0x12   : > { %v122_v8 = vsel %vm121_vm2, -650.762, %v119_v6  ;;  %v123_v9 = vsel %vm121_vm2, 16.50762, %v120_v7  ;;  %vm124_vm4 = vcmp.ge.f32.partialorder %v112_v0, 0.01 }
  0x13   : > { %v125_v10 = vsel %vm124_vm4, -211.32486, %v122_v8  ;;  %v126_v11 = vsel %vm124_vm4, 12.113249, %v123_v9  ;;  %vm127_vm5 = vcmp.ge.f32.partialorder %v112_v0, 0.03 }
  0x14   : > { %v128_v12 = vsel %vm127_vm5, -37.303215, %v125_v10  ;;  %v129_v13 = vsel %vm127_vm5, 6.892599, %v126_v11  ;;  %vm130_vm6 = vcmp.ge.f32.partialorder %v112_v0, 0.1 }
  0x15   : > { %v131_v14 = vsel %vm130_vm6, -9.262096, %v128_v12  ;;  %v132_v15 = vsel %vm130_vm6, 4.088487, %v129_v13  ;;  %vm133_vm7 = vcmp.ge.f32.partialorder %v112_v0, 0.2 }
  0x16   : > { %v134_v16 = vsel %vm133_vm7, -4.103261, %v131_v14  ;;  %v135_v17 = vsel %vm133_vm7, 3.0567203, %v132_v15  ;;  %vm136_vm8 = vcmp.ge.f32.partialorder %v112_v0, 0.3 }
  0x17   : > { %v137_v18 = vsel %vm136_vm8, -1.1796312, %v134_v16  ;;  %v138_v19 = vsel %vm136_vm8, 2.1796312, %v135_v17  ;;  %vm145_vm10 = vcmp.ge.f32.partialorder %v112_v0, 4.0  ;;  %vm148_vm11 = vcmp.ge.f32.partialorder %v112_v0, 8.0 }
  0x18   : > { %v140_v20 = vsel %vm139_vm3, -0.29289323, %v137_v18  ;;  %v141_v21 = vsel %vm139_vm3, 1.2928932, %v138_v19  ;;  %vm151_vm12 = vcmp.ge.f32.partialorder %v112_v0, 16.0  ;;  %v114_v24 = vmin.f32 %v113_v1, 1024.0 }
  0x19   : > { %v143_v22 = vsel %vm142_vm9, -0.10355339, %v140_v20  ;;  %v144_v23 = vsel %vm142_vm9, 0.91421354, %v141_v21  ;;  %vm154_vm13 = vcmp.ge.f32.partialorder %v112_v0, 64.0 }
  0x1a   : > { %v146_v25 = vsel %vm145_vm10, -0.036611654, %v143_v22  ;;  %v147_v26 = vsel %vm145_vm10, 0.6464466, %v144_v23 }
  0x1b   : > { %v149_v27 = vsel %vm148_vm11, -0.012944174, %v146_v25  ;;  %v150_v28 = vsel %vm148_vm11, 0.45710677, %v147_v26 }
  0x1c   : > { %v152_v29 = vsel %vm151_vm12, -0.0026041667, %v149_v27  ;;  %v153_v30 = vsel %vm151_vm12, 0.29166666, %v150_v28 }
  0x1d   : > { %v155_v31 = vsel %vm154_vm13, -9.765625e-05, %v152_v29  ;;  %v156_v32 = vsel %vm154_vm13, 0.13125, %v153_v30 }
  0x1e   : > { %v157_v33 = vmul.f32 %v155_v31, %v114_v24 }
  0x20   : > { %v158_v34 = vadd.f32 %v157_v33, %v156_v32 }
  0x22   : > { %159 = vst [vmem:[%s111_s14] sm:$0xff] %v158_v34 }
  0x23 PF: > { %s11_s6 = sadd.s32 1, %s238_s6  }
  0x24   : > { %p8_p4 = scmp.ge.s32.totalorder %s11_s6, 4  }
  0x26   :  { %10 = sbr.rel (!%p8_p4) target bundleno = 1 (0x1), region = 54 }

</bundles_post_ra>
